<compile_context>
chip_gen: v6e
topology: v6e:2x2x1
jax: 0.10.0
libtpu: 0.0.40
codegen_flags: <defaults>
</compile_context>

<pallas_src>
import functools

import jax
import jax.numpy as jnp
import numpy as np
from jax.experimental import pallas as pl
from jax.experimental.pallas import tpu as pltpu


def _convt_silu_kernel(x_ref, w_ref, b_ref, o_ref):
    # x_ref: (N*Cin, HW) VMEM   w_ref: (N*Cout, N*Cin) VMEM (block-diag, zero-padded)
    # b_ref: (N*Cout, 1) VMEM   o_ref: (N*Cout, HW) VMEM
    v1 = jnp.dot(w_ref[...], x_ref[...], preferred_element_type=jnp.float32)
    v1 = v1 + b_ref[...]                       # broadcast (rows, 1) across lanes
    o_ref[...] = v1 * jax.nn.sigmoid(v1)       # SiLU gate, one dense unmasked store


def convt1x1_silu(x, weight, bias, *, groups):
    """x: (N, Cin, H, W) f32.  weight: (Cin, Cout//groups) f32 (1x1 kernel squeezed).
    bias: (Cout,) f32.  Returns (N, Cout, H-2, W-2) f32 (padding=1, kernel=1, stride=1)."""
    N, Cin, H, W = x.shape
    cout_per_g = weight.shape[1]
    cin_per_g = Cin // groups
    Cout = cout_per_g * groups
    HW = H * W

    # Dense (Cout, Cin) weight with zeros for cross-group entries (exact: 0 * x adds 0).
    w_dense = jnp.zeros((Cout, Cin), jnp.float32)
    for g in range(groups):                     # tiny static trace-time loop
        rows = slice(g * cout_per_g, (g + 1) * cout_per_g)
        cols = slice(g * cin_per_g, (g + 1) * cin_per_g)
        w_dense = w_dense.at[rows, cols].set(weight[cols, :].astype(jnp.float32).T)
    # Block-diagonal over the batch so one matmul covers all N samples at once.
    w_big = jnp.kron(jnp.eye(N, dtype=jnp.float32), w_dense)        # (N*Cout, N*Cin)
    b_col = jnp.tile(bias.astype(jnp.float32).reshape(Cout, 1), (N, 1))  # (N*Cout, 1)

    x2d = x.reshape(N * Cin, HW).astype(jnp.float32)                # free reshape, NCHW

    out2d = pl.pallas_call(
        _convt_silu_kernel,
        out_shape=jax.ShapeDtypeStruct((N * Cout, HW), jnp.float32),
        in_specs=[
            pl.BlockSpec(memory_space=pltpu.MemorySpace.VMEM),       # x  (16, 256)
            pl.BlockSpec(memory_space=pltpu.MemorySpace.VMEM),       # W  (8, 16)
            pl.BlockSpec(memory_space=pltpu.MemorySpace.VMEM),       # b  (8, 1)
        ],
        out_specs=pl.BlockSpec(memory_space=pltpu.MemorySpace.VMEM), # out (8, 256)
    )(x2d, w_big, b_col)

    out = out2d.reshape(N, Cout, H, W)
    # padding=1 with a 1x1 stride-1 transposed conv == crop one border pixel per side.
    return out[:, :, 1:H - 1, 1:W - 1]


if __name__ == "__main__":
    key = jax.random.PRNGKey(0)
    k_x, k_w, k_b = jax.random.split(key, 3)

    N, Cin, H, W = 2, 8, 16, 16
    groups = 4
    Cout = 4
    cout_per_g = Cout // groups
    cin_per_g = Cin // groups

    fan = cin_per_g  # kH*kW*(Cin/groups) = 1*1*2
    bound = 1.0 / np.sqrt(fan)
    x = jax.random.normal(k_x, (N, Cin, H, W), dtype=jnp.float32)
    # ConvTranspose2d weight shape is (Cin, Cout//groups, 1, 1) — 1x1 kernel squeezed.
    weight = jax.random.uniform(k_w, (Cin, cout_per_g), jnp.float32, -bound, bound)
    bias = jax.random.uniform(k_b, (Cout,), jnp.float32, -bound, bound)

    fn = jax.jit(functools.partial(convt1x1_silu, groups=groups))
    out = fn(x, weight, bias)
    jax.block_until_ready(out)
    assert out.shape == (N, Cout, H - 2, W - 2), out.shape

    # pure-JAX reference: grouped 1x1 conv-transpose, crop border, SiLU gating.
    ref_chunks = []
    for g in range(groups):
        xg = x[:, g * cin_per_g:(g + 1) * cin_per_g]            # (N, 2, H, W)
        wg = weight[g * cin_per_g:(g + 1) * cin_per_g]          # (2, 1)
        ref_chunks.append(jnp.einsum("nchw,co->nohw", xg, wg))
    v1 = jnp.concatenate(ref_chunks, axis=1) + bias.reshape(1, Cout, 1, 1)
    v1 = v1[:, :, 1:H - 1, 1:W - 1]
    ref = v1 * jax.nn.sigmoid(v1)
    np.testing.assert_allclose(np.asarray(out), np.asarray(ref), rtol=1e-5, atol=1e-5)

    print("KERNEL_OK")
</pallas_src>

<mosaic_0001>
module attributes {stable_mosaic.version = 11 : i64} {
  func.func @_convt_silu_kernel(%arg0: memref<16x256xf32, #tpu.memory_space<vmem>>, %arg1: memref<8x16xf32, #tpu.memory_space<vmem>>, %arg2: memref<8x1xf32, #tpu.memory_space<vmem>>, %arg3: memref<8x256xf32, #tpu.memory_space<vmem>>) attributes {dimension_semantics = [], scalar_prefetch = 0 : i64, scratch_operands = 0 : i64, tpu.core_type = #tpu.core_type<tc>} {
    %c0 = arith.constant 0 : index
    %c0_0 = arith.constant 0 : index
    %0 = vector.load %arg1[%c0, %c0_0] : memref<8x16xf32, #tpu.memory_space<vmem>>, vector<8x16xf32>
    %c0_1 = arith.constant 0 : index
    %c0_2 = arith.constant 0 : index
    %1 = vector.load %arg0[%c0_1, %c0_2] : memref<16x256xf32, #tpu.memory_space<vmem>>, vector<16x256xf32>
    %cst = arith.constant dense<0.000000e+00> : vector<8x256xf32>
    %2 = tpu.matmul %0, %1, %cst {dimension_numbers = #tpu.dot_dimension_numbers<[1], [0], [0], [1], [0, 0, 1, 1], [], []>} : vector<8x16xf32>, vector<16x256xf32>, vector<8x256xf32> -> vector<8x256xf32>
    %c0_3 = arith.constant 0 : index
    %c0_4 = arith.constant 0 : index
    %3 = vector.load %arg2[%c0_3, %c0_4] : memref<8x1xf32, #tpu.memory_space<vmem>>, vector<8x1xf32>
    %4 = vector.broadcast %3 : vector<8x1xf32> to vector<8x256xf32>
    %5 = arith.addf %2, %4 : vector<8x256xf32>
    %6 = arith.negf %5 : vector<8x256xf32>
    %7 = math.exp %6 : vector<8x256xf32>
    %cst_5 = arith.constant 1.000000e+00 : f32
    %8 = vector.broadcast %cst_5 : f32 to vector<8x256xf32>
    %9 = arith.addf %8, %7 : vector<8x256xf32>
    %10 = arith.divf %8, %9 : vector<8x256xf32>
    %11 = arith.mulf %5, %10 : vector<8x256xf32>
    %c0_6 = arith.constant 0 : index
    %c0_7 = arith.constant 0 : index
    %12 = vector.load %arg3[%c0_6, %c0_7] : memref<8x256xf32, #tpu.memory_space<vmem>>, vector<8x256xf32>
    tpu.vector_store %arg3[%c0_6, %c0_7], %11 {strides = array<i32>} : memref<8x256xf32, #tpu.memory_space<vmem>>, vector<8x256xf32>,
    return
  }
}

</mosaic_0001>

<bundles_post_ra>
// kernel: convt1x1_silu.1
= control target key start
LH: loop header
LB: loop body
LE: loop exit
PB: predicated region body
PF: predicated region fallthrough
CT: control target
= control target key end

     0   :  { %v134_v3 = vmov 0.0   ;;  %v135_v4 = vmov 0   ;;  %vm25_vm0 = vcmask 130048   ;;  %s180_s0 = inlined_call_operand.vmem [shape: f32[16,256], index: 0, kind: input, shape index: {}]   ;;  %s181_s1 = inlined_call_operand.vmem [shape: f32[8,16], index: 1, kind: input, shape index: {}]   ;;  %s182_s2 = inlined_call_operand.vmem [shape: f32[8,1], index: 2, kind: input, shape index: {}]   ;;  %s183_s3 = inlined_call_operand.vmem [shape: f32[8,256], index: 3, kind: output, shape index: {}]  }
   0x1   :  { %v18_v0 = vld [vmem:[%s180_s0 + $0x18] sm:$0xff]  ;;  %v17_v1 = vld [vmem:[%s180_s0 + $0x10] sm:$0xff]  ;;  %v16_v2 = vld [vmem:[%s180_s0 + $0x8] sm:$0xff]  ;;  %93 = vmatprep.mubr.f32.mxu0 %v134_v3  ;;  %125 = vset.pattern.permute.xlu0 %v135_v4 }
   0x2   :  { %57 = vmatprep.subr.mxu0 %v18_v0  ;;  %v15_v5 = vld [vmem:[%s180_s0] sm:$0xff] }
   0x3   :  { %v19_v6 = vld [vmem:[%s182_s2] sm:$0xff]  ;;  %58 = vmatpush1.msra.mxu0 %v17_v1 }
   0x4   :  { %v14_v7 = vld [vmem:[%s181_s1] sm:$0xff]  ;;  %22 = vperm.xlu0 %125, %v19_v6   ;;  %59 = vmatprep.subr.mxu0 %v16_v2 }
   0x5   :  { %60 = vmatpush1.msra.mxu0 %v15_v5 }
   0x6   :  { %120 = vmatmul.mubr.msk.f32.vlgmr.msra.gmra.mxu0 %vm25_vm0, %v14_v7 }
  0x7f   :  { %v23_v8 = vpop.permute.xlu0 %22 }
  0xc6   :  { %v95_v9 = vpop.f32.mrf.mxu0 }
  0xc7   :  { %v96_v10 = vadd.f32 %v95_v9, %v23_v8 }
  0xc8   :  { %v97_v11 = vpop.f32.mrf.mxu0 }
  0xc9   :  { %v121_v12 = vmul.f32 -1.442695, %v96_v10  ;;  %v98_v13 = vadd.f32 %v97_v11, %v23_v8 }
  0xcb   :  { %126 = vpow2.f32 %v121_v12  ;;  %v122_v14 = vmul.f32 -1.442695, %v98_v13 }
  0xcd   :  { %128 = vpow2.f32 %v122_v14 }
  0xd8   :  { %v127_v15 = vpop.eup %126 }
  0xd9   :  { %v106_v16 = vadd.f32 1.0, %v127_v15 }
  0xda   :  { %v129_v17 = vpop.eup %128 }
  0xdb   :  { %130 = vrcp.f32 %v106_v16  ;;  %v107_v18 = vadd.f32 1.0, %v129_v17 }
  0xdd   :  { %132 = vrcp.f32 %v107_v18 }
  0xe8   :  { %v131_v19 = vpop.eup %130 }
  0xe9   :  { %v112_v20 = vmul.f32 %v131_v19, %v96_v10 }
  0xea   :  { %v133_v21 = vpop.eup %132 }
  0xeb   :  { %114 = vst [vmem:[%s183_s3] sm:$0xff] %v112_v20  ;;  %v113_v22 = vmul.f32 %v133_v21, %v98_v13 }
  0xed   :  { %115 = vst [vmem:[%s183_s3 + $0x8] sm:$0xff] %v113_v22 }

</bundles_post_ra>
